<compile_context>
chip_gen: v6e
topology: v6e:2x2x1
jax: 0.10.0
libtpu: 0.0.40
codegen_flags: <defaults>
</compile_context>

<pallas_src>
import functools

import jax
import jax.numpy as jnp
from jax.experimental import pallas as pl
from jax.experimental.pallas import tpu as pltpu

HIDDEN_SIZE = 64
LANE = 128


def _round_up(x, m):
    return ((x + m - 1) // m) * m


def _agent_kernel(obs_ref, w1_ref, b1_ref, w2_ref, b2_ref, w3_ref, b3_ref,
                  out_ref):
    """Fused 3-layer MLP (fc1 -> relu -> mlp -> relu -> fc2) on one batch tile.

    Matmul operands use the weights' dtype (bf16 or f32); accumulation, bias
    add and relu stay in f32.  The obs cast is done here (per tile) so the
    wrapper never makes an extra HBM pass over the input.
    """
    wdt = w1_ref.dtype

    # fc1 + relu
    h1 = jnp.dot(obs_ref[...].astype(wdt), w1_ref[...],
                 preferred_element_type=jnp.float32)
    h1 = jnp.maximum(h1 + b1_ref[...], 0.0)

    # mlp + relu
    h2 = jnp.dot(h1.astype(wdt), w2_ref[...],
                 preferred_element_type=jnp.float32)
    h2 = jnp.maximum(h2 + b2_ref[...], 0.0)

    # fc2 (no activation)
    y = jnp.dot(h2.astype(wdt), w3_ref[...],
                preferred_element_type=jnp.float32)
    out_ref[...] = (y + b3_ref[...]).astype(out_ref.dtype)


def prepare_params(params, *, use_bf16=True):
    """One-time padding / casting of the (tiny) weights.

    * hidden dim (64) is zero-padded to 128 lanes so the two intermediate
      matmul results are full, unmasked 128-lane vregs.
    * w3/b3 are padded only along K (rows) -- the output keeps its true
      out_feature width so no extra HBM writeback is generated.
    * matmul operands are cast to bf16 (f32 accumulation happens in-kernel);
      biases stay f32 since they are added after accumulation.
    """
    hid_pad = _round_up(HIDDEN_SIZE, LANE)  # 128
    pad_h = hid_pad - HIDDEN_SIZE
    wdt = jnp.bfloat16 if use_bf16 else jnp.float32

    w1 = jnp.pad(params["w1"], ((0, 0), (0, pad_h))).astype(wdt)
    b1 = jnp.pad(params["b1"], ((0, 0), (0, pad_h)))
    w2 = jnp.pad(params["w2"], ((0, pad_h), (0, pad_h))).astype(wdt)
    b2 = jnp.pad(params["b2"], ((0, 0), (0, pad_h)))
    w3 = jnp.pad(params["w3"], ((0, pad_h), (0, 0))).astype(wdt)  # K-pad only
    b3 = params["b3"]
    return {"w1": w1, "b1": b1, "w2": w2, "b2": b2, "w3": w3, "b3": b3}


@functools.partial(jax.jit, static_argnames=("tile_b",))
def agent_forward(obs, prepared, *, tile_b=4096):
    """obs: (B, in_feature) float32; prepared: output of `prepare_params`.

    Returns (B, out_feature) float32.
    """
    B, in_feature = obs.shape
    hid_pad = prepared["w1"].shape[1]
    out_feature = prepared["w3"].shape[1]

    # Tiling:
    #  * small/medium B: single block (no per-step overhead, no 8-divisibility
    #    constraint since block == full dim).
    #  * larger B: big tiles (default 4096 rows), and at least 2 grid steps so
    #    the "parallel" batch axis can be split across v7x's two TensorCores.
    #    Pallas masks the edge block, so no jnp.pad copy of obs is needed.
    if B <= 1024:
        tb = B
    else:
        tb = min(tile_b, _round_up(pl.cdiv(B, 2), 8))
        tb = _round_up(tb, 8)
    grid = (pl.cdiv(B, tb),)

    return pl.pallas_call(
        _agent_kernel,
        out_shape=jax.ShapeDtypeStruct((B, out_feature), jnp.float32),
        grid_spec=pltpu.PrefetchScalarGridSpec(
            num_scalar_prefetch=0,
            grid=grid,
            in_specs=[
                # per-tile batch slab of observations (f32; cast in-kernel)
                pl.BlockSpec((tb, in_feature), lambda i: (i, 0)),
                # weights / biases are small: keep the full arrays resident
                pl.BlockSpec((in_feature, hid_pad), lambda i: (0, 0)),
                pl.BlockSpec((1, hid_pad), lambda i: (0, 0)),
                pl.BlockSpec((hid_pad, hid_pad), lambda i: (0, 0)),
                pl.BlockSpec((1, hid_pad), lambda i: (0, 0)),
                pl.BlockSpec((hid_pad, out_feature), lambda i: (0, 0)),
                pl.BlockSpec((1, out_feature), lambda i: (0, 0)),
            ],
            out_specs=pl.BlockSpec((tb, out_feature), lambda i: (i, 0)),
        ),
        compiler_params=pltpu.CompilerParams(
            dimension_semantics=("parallel",)),
    )(obs, prepared["w1"], prepared["b1"], prepared["w2"], prepared["b2"],
      prepared["w3"], prepared["b3"])


def init_agent_params(key, in_feature, out_feature):
    """Deterministic init mimicking nn.Linear (uniform +/- 1/sqrt(fan_in)).

    Weights are stored pre-transposed as (fan_in, fan_out)."""
    ks = jax.random.split(key, 6)

    def linear(kw, kb, fan_in, fan_out):
        bound = 1.0 / jnp.sqrt(jnp.float32(fan_in))
        w = jax.random.uniform(kw, (fan_in, fan_out), jnp.float32,
                               minval=-bound, maxval=bound)
        b = jax.random.uniform(kb, (1, fan_out), jnp.float32,
                               minval=-bound, maxval=bound)
        return w, b

    w1, b1 = linear(ks[0], ks[1], in_feature, HIDDEN_SIZE)
    w2, b2 = linear(ks[2], ks[3], HIDDEN_SIZE, HIDDEN_SIZE)
    w3, b3 = linear(ks[4], ks[5], HIDDEN_SIZE, out_feature)
    return {"w1": w1, "b1": b1, "w2": w2, "b2": b2, "w3": w3, "b3": b3}


def agent_reference(obs, params):
    """Pure-JAX reference of the PyTorch forward pass."""
    h1 = jnp.maximum(obs @ params["w1"] + params["b1"], 0.0)
    h2 = jnp.maximum(h1 @ params["w2"] + params["b2"], 0.0)
    return h2 @ params["w3"] + params["b3"]


if __name__ == "__main__":
    B, IN_FEATURE, OUT_FEATURE = 16, 32, 16

    key = jax.random.PRNGKey(0)
    k_obs, k_par, k_big = jax.random.split(key, 3)

    obs = jax.random.normal(k_obs, (B, IN_FEATURE), jnp.float32)
    params = init_agent_params(k_par, IN_FEATURE, OUT_FEATURE)
    ref = agent_reference(obs, params)

    # --- exact f32 path (small batch, single block) ---------------------------
    prep_f32 = prepare_params(params, use_bf16=False)
    out_f32 = jax.block_until_ready(agent_forward(obs, prep_f32))
    assert out_f32.shape == (B, OUT_FEATURE), out_f32.shape
    assert jnp.allclose(out_f32, ref, atol=1e-5, rtol=1e-5), (
        float(jnp.max(jnp.abs(out_f32 - ref))))

    # --- default bf16-MXU path (f32 accumulation), small batch ----------------
    prep = prepare_params(params)  # bf16 matmul operands
    out_bf16 = jax.block_until_ready(agent_forward(obs, prep))
    assert out_bf16.shape == (B, OUT_FEATURE), out_bf16.shape
    assert jnp.max(jnp.abs(out_bf16 - ref)) < 5e-2, (
        float(jnp.max(jnp.abs(out_bf16 - ref))))

    # --- larger batch: tiled path (>=2 grid steps, masked edge block) ---------
    big_b = 3000
    obs_big = jax.random.normal(k_big, (big_b, IN_FEATURE), jnp.float32)
    ref_big = agent_reference(obs_big, params)
    out_big = jax.block_until_ready(agent_forward(obs_big, prep))
    assert out_big.shape == (big_b, OUT_FEATURE), out_big.shape
    assert jnp.max(jnp.abs(out_big - ref_big)) < 5e-2, (
        float(jnp.max(jnp.abs(out_big - ref_big))))

    out_big_f32 = jax.block_until_ready(agent_forward(obs_big, prep_f32))
    assert jnp.allclose(out_big_f32, ref_big, atol=1e-5, rtol=1e-5), (
        float(jnp.max(jnp.abs(out_big_f32 - ref_big))))

    print("KERNEL_OK")
</pallas_src>

<mosaic_0001>
module attributes {stable_mosaic.version = 11 : i64} {
  func.func @_agent_kernel(%arg0: i32, %arg1: memref<16x32xf32, #tpu.memory_space<vmem>>, %arg2: memref<32x128xf32, #tpu.memory_space<vmem>>, %arg3: memref<1x128xf32, #tpu.memory_space<vmem>>, %arg4: memref<128x128xf32, #tpu.memory_space<vmem>>, %arg5: memref<1x128xf32, #tpu.memory_space<vmem>>, %arg6: memref<128x16xf32, #tpu.memory_space<vmem>>, %arg7: memref<1x16xf32, #tpu.memory_space<vmem>>, %arg8: memref<16x16xf32, #tpu.memory_space<vmem>>) attributes {dimension_semantics = [#tpu.dimension_semantics<parallel>], iteration_bounds = array<i64: 1>, scalar_prefetch = 0 : i64, scratch_operands = 0 : i64, tpu.core_type = #tpu.core_type<tc>, window_params = [{transform_indices = @transform_0, window_bounds = array<i64: 16, 32>}, {pipeline_mode = #tpu.pipeline_mode<synchronous>, transform_indices = @transform_1, window_bounds = array<i64: 32, 128>}, {pipeline_mode = #tpu.pipeline_mode<synchronous>, transform_indices = @transform_2, window_bounds = array<i64: 1, 128>}, {pipeline_mode = #tpu.pipeline_mode<synchronous>, transform_indices = @transform_3, window_bounds = array<i64: 128, 128>}, {pipeline_mode = #tpu.pipeline_mode<synchronous>, transform_indices = @transform_4, window_bounds = array<i64: 1, 128>}, {pipeline_mode = #tpu.pipeline_mode<synchronous>, transform_indices = @transform_5, window_bounds = array<i64: 128, 16>}, {pipeline_mode = #tpu.pipeline_mode<synchronous>, transform_indices = @transform_6, window_bounds = array<i64: 1, 16>}, {transform_indices = @transform_7, window_bounds = array<i64: 16, 16>}]} {
    %c0 = arith.constant 0 : index
    %c0_0 = arith.constant 0 : index
    %0 = vector.load %arg1[%c0, %c0_0] : memref<16x32xf32, #tpu.memory_space<vmem>>, vector<16x32xf32>
    %c0_1 = arith.constant 0 : index
    %c0_2 = arith.constant 0 : index
    %1 = vector.load %arg2[%c0_1, %c0_2] : memref<32x128xf32, #tpu.memory_space<vmem>>, vector<32x128xf32>
    %cst = arith.constant dense<0.000000e+00> : vector<16x128xf32>
    %2 = tpu.matmul %0, %1, %cst {dimension_numbers = #tpu.dot_dimension_numbers<[1], [0], [0], [1], [0, 0, 1, 1], [], []>} : vector<16x32xf32>, vector<32x128xf32>, vector<16x128xf32> -> vector<16x128xf32>
    %c0_3 = arith.constant 0 : index
    %c0_4 = arith.constant 0 : index
    %3 = vector.load %arg3[%c0_3, %c0_4] : memref<1x128xf32, #tpu.memory_space<vmem>>, vector<1x128xf32>
    %4 = vector.broadcast %3 : vector<1x128xf32> to vector<16x128xf32>
    %5 = arith.addf %2, %4 : vector<16x128xf32>
    %cst_5 = arith.constant 0.000000e+00 : f32
    %6 = vector.broadcast %cst_5 : f32 to vector<16x128xf32>
    %7 = arith.maximumf %5, %6 : vector<16x128xf32>
    %c0_6 = arith.constant 0 : index
    %c0_7 = arith.constant 0 : index
    %8 = vector.load %arg4[%c0_6, %c0_7] : memref<128x128xf32, #tpu.memory_space<vmem>>, vector<128x128xf32>
    %cst_8 = arith.constant dense<0.000000e+00> : vector<16x128xf32>
    %9 = tpu.matmul %7, %8, %cst_8 {dimension_numbers = #tpu.dot_dimension_numbers<[1], [0], [0], [1], [0, 0, 1, 1], [], []>} : vector<16x128xf32>, vector<128x128xf32>, vector<16x128xf32> -> vector<16x128xf32>
    %c0_9 = arith.constant 0 : index
    %c0_10 = arith.constant 0 : index
    %10 = vector.load %arg5[%c0_9, %c0_10] : memref<1x128xf32, #tpu.memory_space<vmem>>, vector<1x128xf32>
    %11 = vector.broadcast %10 : vector<1x128xf32> to vector<16x128xf32>
    %12 = arith.addf %9, %11 : vector<16x128xf32>
    %cst_11 = arith.constant 0.000000e+00 : f32
    %13 = vector.broadcast %cst_11 : f32 to vector<16x128xf32>
    %14 = arith.maximumf %12, %13 : vector<16x128xf32>
    %c0_12 = arith.constant 0 : index
    %c0_13 = arith.constant 0 : index
    %15 = vector.load %arg6[%c0_12, %c0_13] : memref<128x16xf32, #tpu.memory_space<vmem>>, vector<128x16xf32>
    %cst_14 = arith.constant dense<0.000000e+00> : vector<16x16xf32>
    %16 = tpu.matmul %14, %15, %cst_14 {dimension_numbers = #tpu.dot_dimension_numbers<[1], [0], [0], [1], [0, 0, 1, 1], [], []>} : vector<16x128xf32>, vector<128x16xf32>, vector<16x16xf32> -> vector<16x16xf32>
    %c0_15 = arith.constant 0 : index
    %c0_16 = arith.constant 0 : index
    %17 = vector.load %arg7[%c0_15, %c0_16] : memref<1x16xf32, #tpu.memory_space<vmem>>, vector<1x16xf32>
    %18 = vector.broadcast %17 : vector<1x16xf32> to vector<16x16xf32>
    %19 = arith.addf %16, %18 : vector<16x16xf32>
    %c0_17 = arith.constant 0 : index
    %c0_18 = arith.constant 0 : index
    %20 = vector.load %arg8[%c0_17, %c0_18] : memref<16x16xf32, #tpu.memory_space<vmem>>, vector<16x16xf32>
    tpu.vector_store %arg8[%c0_17, %c0_18], %19 {strides = array<i32>} : memref<16x16xf32, #tpu.memory_space<vmem>>, vector<16x16xf32>,
    return
  }
  func.func @transform_0(%arg0: i32) -> (i32, i32) {
    %c0_i32 = arith.constant 0 : i32
    %c0_i32_0 = arith.constant 0 : i32
    return %arg0, %c0_i32 : i32, i32
  }
  func.func @transform_1(%arg0: i32) -> (i32, i32) {
    %c0_i32 = arith.constant 0 : i32
    %c0_i32_0 = arith.constant 0 : i32
    %c0_i32_1 = arith.constant 0 : i32
    return %c0_i32, %c0_i32_0 : i32, i32
  }
  func.func @transform_2(%arg0: i32) -> (i32, i32) {
    %c0_i32 = arith.constant 0 : i32
    %c0_i32_0 = arith.constant 0 : i32
    %c0_i32_1 = arith.constant 0 : i32
    return %c0_i32, %c0_i32_0 : i32, i32
  }
  func.func @transform_3(%arg0: i32) -> (i32, i32) {
    %c0_i32 = arith.constant 0 : i32
    %c0_i32_0 = arith.constant 0 : i32
    %c0_i32_1 = arith.constant 0 : i32
    return %c0_i32, %c0_i32_0 : i32, i32
  }
  func.func @transform_4(%arg0: i32) -> (i32, i32) {
    %c0_i32 = arith.constant 0 : i32
    %c0_i32_0 = arith.constant 0 : i32
    %c0_i32_1 = arith.constant 0 : i32
    return %c0_i32, %c0_i32_0 : i32, i32
  }
  func.func @transform_5(%arg0: i32) -> (i32, i32) {
    %c0_i32 = arith.constant 0 : i32
    %c0_i32_0 = arith.constant 0 : i32
    %c0_i32_1 = arith.constant 0 : i32
    return %c0_i32, %c0_i32_0 : i32, i32
  }
  func.func @transform_6(%arg0: i32) -> (i32, i32) {
    %c0_i32 = arith.constant 0 : i32
    %c0_i32_0 = arith.constant 0 : i32
    %c0_i32_1 = arith.constant 0 : i32
    return %c0_i32, %c0_i32_0 : i32, i32
  }
  func.func @transform_7(%arg0: i32) -> (i32, i32) {
    %c0_i32 = arith.constant 0 : i32
    %c0_i32_0 = arith.constant 0 : i32
    return %arg0, %c0_i32 : i32, i32
  }
}

</mosaic_0001>

<bundles_post_ra>
// kernel: agent_forward.1
= control target key start
LH: loop header
LB: loop body
LE: loop exit
PB: predicated region body
PF: predicated region fallthrough
CT: control target
= control target key end

     0   :  { %12 = vsyncpa [#allocation3], 0  ;;  %s701_s0 = inlined_call_operand.vmem [shape: f32[16,32], index: 0, kind: input, shape index: {}]   ;;  %s702_s1 = inlined_call_operand.hbm [shape: f32[32,128], index: 1, kind: input, shape index: {}]   ;;  %s703_s2 = inlined_call_operand.vmem [shape: f32[1,128], index: 2, kind: input, shape index: {}]   ;;  %s704_s3 = inlined_call_operand.vmem [shape: f32[128,128], index: 3, kind: input, shape index: {}]   ;;  %s705_s4 = inlined_call_operand.vmem [shape: f32[1,128], index: 4, kind: input, shape index: {}]   ;;  %s706_s5 = inlined_call_operand.vmem [shape: f32[128,16], index: 5, kind: input, shape index: {}]   ;;  %s707_s6 = inlined_call_operand.vmem [shape: f32[1,16], index: 6, kind: input, shape index: {}]   ;;  %s708_s7 = inlined_call_operand.hbm [shape: f32[16,16], index: 7, kind: output, shape index: {}]  }
   0x1   :  { %13 = vsyncpa [#allocation4], 0  ;;  %s532_s24 = smov [#allocation2]  }
   0x2   :  { %s21_s25 = sshll.u32 %s532_s24, 4  ;;  %s22_s25 = int_to_ptr.vmem [resolvable:$true] %s21_s25 }
   0x3   :  { %s496_s26 = scalar_lea.vmem %s22_s25, 512  ;;  %p501_p1 = scmp.lt.s32.totalorder %s22_s25, %s22_s25 }
   0x4   :  { %p497_p0 = scmp.ne.s32.totalorder %s22_s25, %s496_s26  ;;  %p502_p2 = scmp.lt.s32.totalorder %s496_s26, %s496_s26 }
   0x6   :  { %p503_p3 = por %p502_p2, %p501_p1 }
   0x8   :  { %p504_p4 = pnand %p503_p3, %p497_p0 }
   0xa   :  { %507 = shalt.err (!%p504_p4)
}
   0xb   :  { %s533_s27 = smov 128   ;;  %s534_s28 = smov 8  }
   0xc   :  { %27 = dma.hbm_to_vmem [thread:$0]  %s702_s1, 512, %s22_s25, [#allocation3], %s533_s27, %s533_s27, %s534_s28  }
   0xd   :  { %528 = dma.done.wait [#allocation3], 512  }
   0xe   :  { %529 = vsyncadd [#allocation3], 4294966784  ;;  %vm54_vm0 = vcmask 261120   ;;  %v46_v0 = vld [vmem:[#allocation2 + $0x18] sm:$0xff]  ;;  %v45_v1 = vld [vmem:[#allocation2 + $0x10] sm:$0xff]  ;;  %vm336_vm1 = vcmask 130048  }
   0xf   :  { %403 = vmatprep.subr.mxu0 %v46_v0  ;;  %v41_v2 = vld [vmem:[%s701_s0] sm:$0xff]  ;;  %v44_v3 = vld [vmem:[#allocation2 + $0x8] sm:$0xff]  ;;  %v153_v4 = vld [vmem:[%s704_s3 + $0x78] sm:$0xff] }
  0x10   :  { %404 = vmatpush3.msra.mxu0 %v46_v0  ;;  %411 = vmatprep.mubr.msk.f32.mxu0 %vm54_vm0, %v41_v2  ;;  %v152_v5 = vld [vmem:[%s704_s3 + $0x70] sm:$0xff]  ;;  %v43_v6 = vld [vmem:[#allocation2] sm:$0xff]  ;;  %v151_v7 = vld [vmem:[%s704_s3 + $0x68] sm:$0xff] }
  0x11   :  { %405 = vmatprep.subr.mxu0 %v45_v1  ;;  %414 = vmatprep.subr.mxu1 %v153_v4  ;;  %v42_v8 = vld [vmem:[%s701_s0 + $0x8] sm:$0xff]  ;;  %v150_v9 = vld [vmem:[%s704_s3 + $0x60] sm:$0xff]  ;;  %v149_v10 = vld [vmem:[%s704_s3 + $0x58] sm:$0xff] }
  0x12   :  { %406 = vmatpush3.msra.mxu0 %v45_v1  ;;  %415 = vmatpush3.msra.mxu1 %v153_v4  ;;  %v148_v11 = vld [vmem:[%s704_s3 + $0x50] sm:$0xff]  ;;  %v147_v12 = vld [vmem:[%s704_s3 + $0x48] sm:$0xff]  ;;  %v146_v13 = vld [vmem:[%s704_s3 + $0x40] sm:$0xff] }
  0x13   :  { %407 = vmatprep.subr.mxu0 %v44_v3  ;;  %416 = vmatprep.subr.mxu1 %v152_v5  ;;  %v145_v14 = vld [vmem:[%s704_s3 + $0x38] sm:$0xff]  ;;  %v144_v15 = vld [vmem:[%s704_s3 + $0x30] sm:$0xff]  ;;  %v143_v16 = vld [vmem:[%s704_s3 + $0x28] sm:$0xff] }
  0x14   :  { %408 = vmatpush3.msra.mxu0 %v44_v3  ;;  %417 = vmatpush3.msra.mxu1 %v152_v5  ;;  %v142_v17 = vld [vmem:[%s704_s3 + $0x20] sm:$0xff]  ;;  %v141_v18 = vld [vmem:[%s704_s3 + $0x18] sm:$0xff]  ;;  %v140_v19 = vld [vmem:[%s704_s3 + $0x10] sm:$0xff] }
  0x15   :  { %409 = vmatprep.subr.mxu0 %v43_v6  ;;  %418 = vmatprep.subr.mxu1 %v151_v7  ;;  %v139_v20 = vld [vmem:[%s704_s3 + $0x8] sm:$0xff]  ;;  %v138_v21 = vld [vmem:[%s704_s3] sm:$0xff]  ;;  %v253_v22 = vld [vmem:[%s706_s5 + $0x78] sm:$0xff] }
  0x16   :  { %410 = vmatpush3.msra.mxu0 %v43_v6  ;;  %419 = vmatpush3.msra.mxu1 %v151_v7  ;;  %v252_v23 = vld [vmem:[%s706_s5 + $0x70] sm:$0xff]  ;;  %v251_v24 = vld [vmem:[%s706_s5 + $0x68] sm:$0xff]  ;;  %v250_v25 = vld [vmem:[%s706_s5 + $0x60] sm:$0xff] }
  0x17   :  { %412 = vmatmul.mubr.msk.f32.vlgmr.msra.gmra.mxu0 %vm54_vm0, %v42_v8  ;;  %420 = vmatprep.subr.mxu1 %v150_v9  ;;  %v249_v26 = vld [vmem:[%s706_s5 + $0x58] sm:$0xff]  ;;  %v248_v27 = vld [vmem:[%s706_s5 + $0x50] sm:$0xff]  ;;  %v247_v28 = vld [vmem:[%s706_s5 + $0x48] sm:$0xff] }
  0x18   :  { %421 = vmatpush3.msra.mxu1 %v150_v9  ;;  %449 = vmatprep.subr.mxu0 %v253_v22  ;;  %v246_v29 = vld [vmem:[%s706_s5 + $0x40] sm:$0xff]  ;;  %v245_v30 = vld [vmem:[%s706_s5 + $0x38] sm:$0xff]  ;;  %v244_v31 = vld [vmem:[%s706_s5 + $0x30] sm:$0xff] }
  0x19   :  { %422 = vmatprep.subr.mxu1 %v149_v10  ;;  %450 = vmatpush3.msra.mxu0 %v253_v22  ;;  %v243_v32 = vld [vmem:[%s706_s5 + $0x28] sm:$0xff]  ;;  %v242_v33 = vld [vmem:[%s706_s5 + $0x20] sm:$0xff]  ;;  %v241_v41 = vld [vmem:[%s706_s5 + $0x18] sm:$0xff] }
  0x1a   :  { %423 = vmatpush3.msra.mxu1 %v149_v10  ;;  %451 = vmatprep.subr.mxu0 %v252_v23  ;;  %v356_v34 = vld [vmem:[%s703_s2] ss:$0 sm:$0xff]  ;;  %v240_v42 = vld [vmem:[%s706_s5 + $0x10] sm:$0xff]  ;;  %v239_v43 = vld [vmem:[%s706_s5 + $0x8] sm:$0xff] }
  0x1b   :  { %424 = vmatprep.subr.mxu1 %v148_v11  ;;  %452 = vmatpush3.msra.mxu0 %v252_v23  ;;  %v238_v44 = vld [vmem:[%s706_s5] sm:$0xff]  ;;  %s535_s5 = smov [#allocation5]  }
  0x1c   :  { %425 = vmatpush3.msra.mxu1 %v148_v11  ;;  %453 = vmatprep.subr.mxu0 %v251_v24  ;;  %v359_v45 = vld [vmem:[%s705_s4] ss:$0 sm:$0xff]  ;;  %s344_s10 = sshll.u32 %s535_s5, 4  ;;  %s345_s10 = int_to_ptr.vmem [resolvable:$true] %s344_s10 }
  0x1d   :  { %426 = vmatprep.subr.mxu1 %v147_v12  ;;  %454 = vmatpush3.msra.mxu0 %v251_v24  ;;  %v360_v52 = vld [vmem:[%s707_s6] ss:$0 sm:$0xff]  ;;  %s508_s4 = scalar_lea.vmem %s345_s10, 256  ;;  %p513_p6 = scmp.lt.s32.totalorder %s345_s10, %s345_s10 }
  0x1e   :  { %427 = vmatpush3.msra.mxu1 %v147_v12  ;;  %455 = vmatprep.subr.mxu0 %v250_v25  ;;  %p509_p5 = scmp.ne.s32.totalorder %s345_s10, %s508_s4  ;;  %p514_p7 = scmp.lt.s32.totalorder %s508_s4, %s508_s4 }
  0x1f   :  { %428 = vmatprep.subr.mxu1 %v146_v13  ;;  %456 = vmatpush3.msra.mxu0 %v250_v25 }
  0x20   :  { %429 = vmatpush3.msra.mxu1 %v146_v13  ;;  %457 = vmatprep.subr.mxu0 %v249_v26  ;;  %p515_p8 = por %p514_p7, %p513_p6 }
  0x21   :  { %430 = vmatprep.subr.mxu1 %v145_v14  ;;  %458 = vmatpush3.msra.mxu0 %v249_v26 }
  0x22   :  { %431 = vmatpush3.msra.mxu1 %v145_v14  ;;  %459 = vmatprep.subr.mxu0 %v248_v27  ;;  %p516_p9 = pnand %p515_p8, %p509_p5 }
  0x23   :  { %432 = vmatprep.subr.mxu1 %v144_v15  ;;  %460 = vmatpush3.msra.mxu0 %v248_v27 }
  0x24   :  { %433 = vmatpush3.msra.mxu1 %v144_v15  ;;  %461 = vmatprep.subr.mxu0 %v247_v28 }
  0x25   :  { %434 = vmatprep.subr.mxu1 %v143_v16  ;;  %462 = vmatpush3.msra.mxu0 %v247_v28 }
  0x26   :  { %435 = vmatpush3.msra.mxu1 %v143_v16  ;;  %463 = vmatprep.subr.mxu0 %v246_v29 }
  0x27   :  { %436 = vmatprep.subr.mxu1 %v142_v17  ;;  %464 = vmatpush3.msra.mxu0 %v246_v29 }
  0x28   :  { %437 = vmatpush3.msra.mxu1 %v142_v17  ;;  %465 = vmatprep.subr.mxu0 %v245_v30 }
  0x29   :  { %438 = vmatprep.subr.mxu1 %v141_v18  ;;  %466 = vmatpush3.msra.mxu0 %v245_v30 }
  0x2a   :  { %439 = vmatpush3.msra.mxu1 %v141_v18  ;;  %467 = vmatprep.subr.mxu0 %v244_v31 }
  0x2b   :  { %440 = vmatprep.subr.mxu1 %v140_v19  ;;  %468 = vmatpush3.msra.mxu0 %v244_v31 }
  0x2c   :  { %441 = vmatpush3.msra.mxu1 %v140_v19  ;;  %469 = vmatprep.subr.mxu0 %v243_v32 }
  0x2d   :  { %442 = vmatprep.subr.mxu1 %v139_v20  ;;  %470 = vmatpush3.msra.mxu0 %v243_v32 }
  0x2e   :  { %443 = vmatpush3.msra.mxu1 %v139_v20  ;;  %471 = vmatprep.subr.mxu0 %v242_v33 }
  0x2f   :  { %444 = vmatprep.subr.mxu1 %v138_v21  ;;  %472 = vmatpush3.msra.mxu0 %v242_v33 }
  0x30   :  { %445 = vmatpush3.msra.mxu1 %v138_v21  ;;  %473 = vmatprep.subr.mxu0 %v241_v41 }
  0x31   :  { %474 = vmatpush3.msra.mxu0 %v241_v41 }
  0x32   :  { %475 = vmatprep.subr.mxu0 %v240_v42 }
  0x33   :  { %476 = vmatpush3.msra.mxu0 %v240_v42 }
  0x34   :  { %477 = vmatprep.subr.mxu0 %v239_v43 }
  0x35   :  { %478 = vmatpush3.msra.mxu0 %v239_v43 }
  0x36   :  { %479 = vmatprep.subr.mxu0 %v238_v44 }
  0x37   :  { %480 = vmatpush3.msra.mxu0 %v238_v44 }
  0xd7   :  { %v413_v35 = vpop.f32.mrf.mxu0 }
  0xd8   :  { %v133_v36 = vadd.f32 %v413_v35, %v356_v34 }
  0xd9   :  { %v127_v37 = vpop.f32.mrf.mxu0 }
  0xda   :  { %v128_v38 = vadd.f32 %v356_v34, %v127_v37  ;;  %v137_v40 = vmax.f32 %v133_v36, 0.0 }
  0xdc   :  { %v136_v39 = vmax.f32 %v128_v38, 0.0 }
  0xde   :  { %446 = vmatprep.mubr.f32.mxu1 %v136_v39 }
  0xdf   :  { %447 = vmatmul.mubr.f32.vlgmr.msra.gmra.mxu1 %v137_v40 }
 0x19f   :  { %v448_v46 = vpop.f32.mrf.mxu1 }
 0x1a0   :  { %v233_v47 = vadd.f32 %v448_v46, %v359_v45 }
 0x1a1   :  { %v227_v48 = vpop.f32.mrf.mxu1 }
 0x1a2   :  { %v228_v49 = vadd.f32 %v359_v45, %v227_v48  ;;  %v237_v51 = vmax.f32 %v233_v47, 0.0 }
 0x1a4   :  { %v236_v50 = vmax.f32 %v228_v49, 0.0 }
 0x1a6   :  { %481 = vmatprep.mubr.f32.mxu0 %v236_v50 }
 0x1a7   :  { %482 = vmatmul.mubr.f32.vlgmr.msra.gmra.mxu0 %v237_v51 }
 0x267   :  { %v483_v53 = vpop.f32.mrf.mxu0 }
 0x268   :  { %v333_v54 = vadd.f32 %v483_v53, %v360_v52 }
 0x269   :  { %v327_v55 = vpop.f32.mrf.mxu0 }
 0x26a   :  { %v328_v56 = vadd.f32 %v360_v52, %v327_v55  ;;  %338 = vst.msk [vmem:[#allocation5 + $0x8] sm:$0xff] %vm336_vm1, %v333_v54 }
 0x26c   :  { %337 = vst.msk [vmem:[#allocation5] sm:$0xff] %vm336_vm1, %v328_v56 }
 0x26d   :  { %519 = shalt.err (!%p516_p9)
}
 0x26e   :  { %350 = dma.vmem_to_hbm [thread:$0]  %s345_s10, 256, %s708_s7, [#allocation4], %s533_s27, %s533_s27, %s534_s28  }
 0x26f   :  { %530 = dma.done.wait [#allocation4], 256  }
 0x270   :  { %531 = vsyncadd [#allocation4], 4294967040 }
 0x271   :  { %354 = vsyncpa [#allocation3], 1 }
 0x272   :  { %355 = vsyncpa [#allocation4], 1 }

</bundles_post_ra>
